<compile_context>
chip_gen: v6e
topology: v6e:2x2x1
jax: 0.10.0
libtpu: 0.0.40
codegen_flags: <defaults>
</compile_context>

<pallas_src>
import functools

import jax
import jax.numpy as jnp
from jax.experimental import pallas as pl
from jax.experimental.pallas import tpu as pltpu


def _memory_block_kernel(*refs, lp, rp, has_mask):
    # refs (has_mask=True):  x_ref (1,T,Dt), keep_ref (1,T,1), w_ref (F,Dt),
    #                        o_ref (1,T,Dt), xpad_sc (T+F-1, Dt) f32 scratch
    # refs (has_mask=False): x_ref, w_ref, o_ref, xpad_sc
    if has_mask:
        x_ref, keep_ref, w_ref, o_ref, xpad_sc = refs
    else:
        x_ref, w_ref, o_ref, xpad_sc = refs

    T = x_ref.shape[1]
    Dt = x_ref.shape[2]
    F = w_ref.shape[0]

    # Single upcast pass of the raw input tile (important on v5e: no bf16 VALU).
    x_m = x_ref[0].astype(jnp.float32)
    if has_mask:
        # one explicit broadcast of the keep mask, reused for pre- and post-mask
        keep = jnp.broadcast_to(keep_ref[0].astype(jnp.float32), (T, Dt))
        x_m = x_m * keep                      # masked_fill(mask, 0) on the input

    # Fused zero-padding: zero only the halo rows of the scratch, then write
    # the (masked) input into the interior.  Halo rows are never written with
    # data, so re-zeroing F-1 rows per grid step is cheap.
    if lp > 0:
        xpad_sc[0:lp, :] = jnp.zeros((lp, Dt), jnp.float32)
    if rp > 0:
        xpad_sc[lp + T:lp + T + rp, :] = jnp.zeros((rp, Dt), jnp.float32)
    xpad_sc[lp:lp + T, :] = x_m

    # Hoist the weight load once; residual is already folded into tap `lp`.
    w_all = w_ref[...].astype(jnp.float32)    # (F, Dt)

    acc = jnp.zeros((T, Dt), jnp.float32)
    for k in range(F):                        # static, small filter -> unrolled
        acc = acc + xpad_sc[k:k + T, :] * w_all[k, :]

    if has_mask:
        acc = acc * keep                      # masked_fill(mask, 0) on the output
    o_ref[0] = acc.astype(o_ref.dtype)


def memory_block_v2(x, weight, mask=None, *, filter_size, shift):
    """x: (B, T, D); weight: (D, 1, F) like nn.Conv1d(d, d, F, groups=d, bias=False);
    mask: optional (B, T) bool (True = zero out)."""
    B, T, D = x.shape
    F = filter_size
    lp = int(round((F - 1) / 2))
    rp = int((F - 1) / 2)
    if shift > 0:
        lp += shift
        rp -= shift
    assert lp + rp == F - 1 and lp >= 0 and rp >= 0

    # (D,1,F) -> (F,D); fold the residual add into the filter: since the
    # residual equals xpad[lp:lp+T] (the un-shifted tap), out = conv + x is
    # exactly conv with w[lp] += 1.
    w = jnp.transpose(weight[:, 0, :], (1, 0)).astype(jnp.float32)
    w = w.at[lp].add(1.0)

    # D tile: lane-dense (multiple of 128, <= 512 keeps the v7x 64 MiB VMEM
    # budget comfortable when double-buffered) when D allows; otherwise the
    # whole D (block-equals-full-dim escape hatch for toy shapes).
    if D % 128 == 0:
        dt = min(D, 512)
        while D % dt != 0:
            dt //= 2
    else:
        dt = D
    assert dt == D or dt % 128 == 0
    nd = D // dt

    has_mask = mask is not None
    Tp = T + F - 1
    dsize = jnp.dtype(x.dtype).itemsize
    cost = pl.CostEstimate(
        flops=2 * F * B * T * D,
        transcendentals=0,
        bytes_accessed=2 * B * T * D * dsize + F * D * 4
                       + (B * T * 4 if has_mask else 0),
    )

    kern = functools.partial(_memory_block_kernel, lp=lp, rp=rp, has_mask=has_mask)

    in_specs = [pl.BlockSpec((1, T, dt), lambda b, d: (b, 0, d))]
    args = [x]
    if has_mask:
        keep = jnp.where(mask, 0.0, 1.0).astype(jnp.float32)[..., None]  # (B,T,1)
        in_specs.append(pl.BlockSpec((1, T, 1), lambda b, d: (b, 0, 0)))
        args.append(keep)
    in_specs.append(pl.BlockSpec((F, dt), lambda b, d: (0, d)))
    args.append(w)

    out = pl.pallas_call(
        kern,
        out_shape=jax.ShapeDtypeStruct((B, T, D), x.dtype),
        grid_spec=pltpu.PrefetchScalarGridSpec(
            num_scalar_prefetch=0,
            grid=(B, nd),
            in_specs=in_specs,
            out_specs=pl.BlockSpec((1, T, dt), lambda b, d: (b, 0, d)),
            scratch_shapes=[pltpu.VMEM((Tp, dt), jnp.float32)],
        ),
        compiler_params=pltpu.CompilerParams(
            dimension_semantics=("parallel", "parallel")),
        cost_estimate=cost,
    )(*args)
    # dropout(p=0.0) is identity; TODO(synk): nonzero-rate (training) dropout
    # would use pltpu.prng_seed / pltpu.prng_random_bits inside the kernel.
    return out


def _reference(x, weight, mask, *, filter_size, shift):
    """Pure-JAX reference matching the PyTorch forward."""
    B, T, D = x.shape
    F = filter_size
    lp = int(round((F - 1) / 2))
    rp = int((F - 1) / 2)
    if shift > 0:
        lp += shift
        rp -= shift
    if mask is not None:
        x = jnp.where(mask[..., None], 0.0, x)
    xp = jnp.pad(x, ((0, 0), (lp, rp), (0, 0)))
    w = jnp.transpose(weight[:, 0, :], (1, 0))  # (F, D)
    out = jnp.zeros_like(x)
    for k in range(F):
        out = out + xp[:, k:k + T, :] * w[k][None, None, :]
    out = out + x
    if mask is not None:
        out = jnp.where(mask[..., None], 0.0, out)
    return out


if __name__ == "__main__":
    key = jax.random.PRNGKey(0)

    # Small toy case matching the module's forward (B, T, D).
    B, T, D = 2, 16, 32
    filter_size, shift = 5, 1
    k1, k2, k3, k4, k5 = jax.random.split(key, 5)
    x = jax.random.normal(k1, (B, T, D), dtype=jnp.float32)
    # nn.Conv1d(d, d, filter_size, groups=d, bias=False) weight shape: (D, 1, F)
    weight = 0.1 * jax.random.normal(k2, (D, 1, filter_size), dtype=jnp.float32)
    mask = jax.random.bernoulli(k3, p=0.25, shape=(B, T))  # True = masked out

    out = memory_block_v2(x, weight, mask, filter_size=filter_size, shift=shift)
    out = jax.block_until_ready(out)
    ref = _reference(x, weight, mask, filter_size=filter_size, shift=shift)
    assert jnp.allclose(out, ref, atol=1e-5, rtol=1e-5), "mismatch vs reference"

    # mask=None path (kernel variant without the keep stream)
    out2 = memory_block_v2(x, weight, None, filter_size=filter_size, shift=shift)
    jax.block_until_ready(out2)
    ref2 = _reference(x, weight, None, filter_size=filter_size, shift=shift)
    assert jnp.allclose(out2, ref2, atol=1e-5, rtol=1e-5), "mismatch (no mask)"

    # Lane-dense / D-tiled path (D % 128 == 0, grid=(B, D//512)), shift=0.
    D2, fs2, sh2 = 1024, 5, 0
    x3 = jax.random.normal(k4, (B, T, D2), dtype=jnp.float32)
    w3 = 0.1 * jax.random.normal(k5, (D2, 1, fs2), dtype=jnp.float32)
    out3 = memory_block_v2(x3, w3, mask, filter_size=fs2, shift=sh2)
    jax.block_until_ready(out3)
    ref3 = _reference(x3, w3, mask, filter_size=fs2, shift=sh2)
    assert jnp.allclose(out3, ref3, atol=1e-5, rtol=1e-5), "mismatch (tiled D)"

    print("KERNEL_OK")
</pallas_src>

<mosaic_0001>
module attributes {stable_mosaic.version = 11 : i64} {
  func.func @_memory_block_kernel(%arg0: i32, %arg1: i32, %arg2: memref<1x16x32xf32, #tpu.memory_space<vmem>>, %arg3: memref<1x16x1xf32, #tpu.memory_space<vmem>>, %arg4: memref<5x32xf32, #tpu.memory_space<vmem>>, %arg5: memref<1x16x32xf32, #tpu.memory_space<vmem>>, %arg6: memref<20x32xf32, #tpu.memory_space<vmem>>) attributes {dimension_semantics = [#tpu.dimension_semantics<parallel>, #tpu.dimension_semantics<parallel>], iteration_bounds = array<i64: 2, 1>, scalar_prefetch = 0 : i64, scratch_operands = 1 : i64, tpu.core_type = #tpu.core_type<tc>, window_params = [{transform_indices = @transform_0, window_bounds = array<i64: 1, 16, 32>}, {transform_indices = @transform_1, window_bounds = array<i64: 1, 16, 1>}, {transform_indices = @transform_2, window_bounds = array<i64: 5, 32>}, {transform_indices = @transform_3, window_bounds = array<i64: 1, 16, 32>}]} {
    %c0 = arith.constant 0 : index
    %c0_0 = arith.constant 0 : index
    %c0_1 = arith.constant 0 : index
    %0 = vector.load %arg2[%c0, %c0_0, %c0_1] : memref<1x16x32xf32, #tpu.memory_space<vmem>>, vector<1x16x32xf32>
    %1 = vector.shape_cast %0 : vector<1x16x32xf32> to vector<16x32xf32>
    %c0_2 = arith.constant 0 : index
    %c0_3 = arith.constant 0 : index
    %c0_4 = arith.constant 0 : index
    %2 = vector.load %arg3[%c0_2, %c0_3, %c0_4] : memref<1x16x1xf32, #tpu.memory_space<vmem>>, vector<1x16x1xf32>
    %3 = vector.shape_cast %2 : vector<1x16x1xf32> to vector<16x1xf32>
    %4 = vector.shape_cast %3 : vector<16x1xf32> to vector<16x1xf32>
    %5 = vector.broadcast %4 : vector<16x1xf32> to vector<16x32xf32>
    %6 = arith.mulf %1, %5 : vector<16x32xf32>
    %cst = arith.constant 0.000000e+00 : f32
    %7 = vector.broadcast %cst : f32 to vector<3x32xf32>
    %c0_5 = arith.constant 0 : index
    %c0_6 = arith.constant 0 : index
    %8 = vector.load %arg6[%c0_5, %c0_6] : memref<20x32xf32, #tpu.memory_space<vmem>>, vector<3x32xf32>
    tpu.vector_store %arg6[%c0_5, %c0_6], %7 {strides = array<i32>} : memref<20x32xf32, #tpu.memory_space<vmem>>, vector<3x32xf32>,
    %cst_7 = arith.constant 0.000000e+00 : f32
    %9 = vector.broadcast %cst_7 : f32 to vector<1x32xf32>
    %c19 = arith.constant 19 : index
    %c0_8 = arith.constant 0 : index
    %10 = vector.load %arg6[%c19, %c0_8] : memref<20x32xf32, #tpu.memory_space<vmem>>, vector<1x32xf32>
    tpu.vector_store %arg6[%c19, %c0_8], %9 {strides = array<i32>} : memref<20x32xf32, #tpu.memory_space<vmem>>, vector<1x32xf32>,
    %c3 = arith.constant 3 : index
    %c0_9 = arith.constant 0 : index
    %11 = vector.load %arg6[%c3, %c0_9] : memref<20x32xf32, #tpu.memory_space<vmem>>, vector<16x32xf32>
    tpu.vector_store %arg6[%c3, %c0_9], %6 {strides = array<i32>} : memref<20x32xf32, #tpu.memory_space<vmem>>, vector<16x32xf32>,
    %c0_10 = arith.constant 0 : index
    %c0_11 = arith.constant 0 : index
    %12 = vector.load %arg4[%c0_10, %c0_11] : memref<5x32xf32, #tpu.memory_space<vmem>>, vector<5x32xf32>
    %cst_12 = arith.constant 0.000000e+00 : f32
    %13 = vector.broadcast %cst_12 : f32 to vector<16x32xf32>
    %c0_13 = arith.constant 0 : index
    %c0_14 = arith.constant 0 : index
    %14 = vector.load %arg6[%c0_13, %c0_14] : memref<20x32xf32, #tpu.memory_space<vmem>>, vector<16x32xf32>
    %15 = vector.extract_strided_slice %12 {offsets = [0, 0], sizes = [1, 32], strides = [1, 1]} : vector<5x32xf32> to vector<1x32xf32>
    %16 = vector.shape_cast %15 : vector<1x32xf32> to vector<32xf32>
    %17 = vector.shape_cast %16 : vector<32xf32> to vector<1x32xf32>
    %18 = vector.broadcast %17 : vector<1x32xf32> to vector<16x32xf32>
    %19 = arith.mulf %14, %18 : vector<16x32xf32>
    %20 = arith.addf %13, %19 : vector<16x32xf32>
    %c1 = arith.constant 1 : index
    %c0_15 = arith.constant 0 : index
    %21 = vector.load %arg6[%c1, %c0_15] : memref<20x32xf32, #tpu.memory_space<vmem>>, vector<16x32xf32>
    %22 = vector.extract_strided_slice %12 {offsets = [1, 0], sizes = [1, 32], strides = [1, 1]} : vector<5x32xf32> to vector<1x32xf32>
    %23 = vector.shape_cast %22 : vector<1x32xf32> to vector<32xf32>
    %24 = vector.shape_cast %23 : vector<32xf32> to vector<1x32xf32>
    %25 = vector.broadcast %24 : vector<1x32xf32> to vector<16x32xf32>
    %26 = arith.mulf %21, %25 : vector<16x32xf32>
    %27 = arith.addf %20, %26 : vector<16x32xf32>
    %c2 = arith.constant 2 : index
    %c0_16 = arith.constant 0 : index
    %28 = vector.load %arg6[%c2, %c0_16] : memref<20x32xf32, #tpu.memory_space<vmem>>, vector<16x32xf32>
    %29 = vector.extract_strided_slice %12 {offsets = [2, 0], sizes = [1, 32], strides = [1, 1]} : vector<5x32xf32> to vector<1x32xf32>
    %30 = vector.shape_cast %29 : vector<1x32xf32> to vector<32xf32>
    %31 = vector.shape_cast %30 : vector<32xf32> to vector<1x32xf32>
    %32 = vector.broadcast %31 : vector<1x32xf32> to vector<16x32xf32>
    %33 = arith.mulf %28, %32 : vector<16x32xf32>
    %34 = arith.addf %27, %33 : vector<16x32xf32>
    %c3_17 = arith.constant 3 : index
    %c0_18 = arith.constant 0 : index
    %35 = vector.load %arg6[%c3_17, %c0_18] : memref<20x32xf32, #tpu.memory_space<vmem>>, vector<16x32xf32>
    %36 = vector.extract_strided_slice %12 {offsets = [3, 0], sizes = [1, 32], strides = [1, 1]} : vector<5x32xf32> to vector<1x32xf32>
    %37 = vector.shape_cast %36 : vector<1x32xf32> to vector<32xf32>
    %38 = vector.shape_cast %37 : vector<32xf32> to vector<1x32xf32>
    %39 = vector.broadcast %38 : vector<1x32xf32> to vector<16x32xf32>
    %40 = arith.mulf %35, %39 : vector<16x32xf32>
    %41 = arith.addf %34, %40 : vector<16x32xf32>
    %c4 = arith.constant 4 : index
    %c0_19 = arith.constant 0 : index
    %42 = vector.load %arg6[%c4, %c0_19] : memref<20x32xf32, #tpu.memory_space<vmem>>, vector<16x32xf32>
    %43 = vector.extract_strided_slice %12 {offsets = [4, 0], sizes = [1, 32], strides = [1, 1]} : vector<5x32xf32> to vector<1x32xf32>
    %44 = vector.shape_cast %43 : vector<1x32xf32> to vector<32xf32>
    %45 = vector.shape_cast %44 : vector<32xf32> to vector<1x32xf32>
    %46 = vector.broadcast %45 : vector<1x32xf32> to vector<16x32xf32>
    %47 = arith.mulf %42, %46 : vector<16x32xf32>
    %48 = arith.addf %41, %47 : vector<16x32xf32>
    %49 = arith.mulf %48, %5 : vector<16x32xf32>
    %c0_20 = arith.constant 0 : index
    %c0_21 = arith.constant 0 : index
    %c0_22 = arith.constant 0 : index
    %50 = vector.load %arg5[%c0_20, %c0_21, %c0_22] : memref<1x16x32xf32, #tpu.memory_space<vmem>>, vector<1x16x32xf32>
    %51 = vector.shape_cast %50 : vector<1x16x32xf32> to vector<16x32xf32>
    %52 = vector.shape_cast %49 : vector<16x32xf32> to vector<1x16x32xf32>
    tpu.vector_store %arg5[%c0_20, %c0_21, %c0_22], %52 {strides = array<i32>} : memref<1x16x32xf32, #tpu.memory_space<vmem>>, vector<1x16x32xf32>,
    return
  }
  func.func @transform_0(%arg0: i32, %arg1: i32) -> (i32, i32, i32) {
    %c0_i32 = arith.constant 0 : i32
    %c0_i32_0 = arith.constant 0 : i32
    return %arg0, %c0_i32, %arg1 : i32, i32, i32
  }
  func.func @transform_1(%arg0: i32, %arg1: i32) -> (i32, i32, i32) {
    %c0_i32 = arith.constant 0 : i32
    %c0_i32_0 = arith.constant 0 : i32
    %c0_i32_1 = arith.constant 0 : i32
    return %arg0, %c0_i32, %c0_i32_0 : i32, i32, i32
  }
  func.func @transform_2(%arg0: i32, %arg1: i32) -> (i32, i32) {
    %c0_i32 = arith.constant 0 : i32
    %c0_i32_0 = arith.constant 0 : i32
    return %c0_i32, %arg1 : i32, i32
  }
  func.func @transform_3(%arg0: i32, %arg1: i32) -> (i32, i32, i32) {
    %c0_i32 = arith.constant 0 : i32
    %c0_i32_0 = arith.constant 0 : i32
    return %arg0, %c0_i32, %arg1 : i32, i32, i32
  }
}

</mosaic_0001>

<bundles_post_ra>
// kernel: tpu_custom_call.1
= control target key start
LH: loop header
LB: loop body
LE: loop exit
PB: predicated region body
PF: predicated region fallthrough
CT: control target
= control target key end

     0   :  { %8 = vsyncpa [#allocation4], 0  ;;  %s802_s0 = inlined_call_operand.vmem [shape: f32[2,16,32], index: 0, kind: input, shape index: {}]   ;;  %s803_s1 = inlined_call_operand.vmem [shape: f32[2,16,1], index: 1, kind: input, shape index: {}]   ;;  %s804_s2 = inlined_call_operand.hbm [shape: f32[5,32], index: 2, kind: input, shape index: {}]   ;;  %s805_s3 = inlined_call_operand.hbm [shape: f32[2,16,32], index: 3, kind: output, shape index: {}]  }
   0x1   :  { %9 = vsyncpa [#allocation5], 0 }
   0x2   :  { %11 = vsyncpa [#allocation5 + $0x1], 0  ;;  %s656_s12 = smov 0   ;;  %s658_s13 = smov 0  }
   0x3   :  { %s660_s14 = smov 0   ;;  %s662_s15 = smov 0  }
   0x4   :  { %s664_s16 = smov 0   ;;  %s666_s17 = smov 0  }
   0x5 LB: > { %s431_s18 = sadd.s32 4294967295, %s628_s17   ;;  %s432_s19 = sadd.s32 4294967294, %s628_s17   ;;  %s628_s17 = sphi %s666_s17, %s17_s17   ;;  %s624_s16 = sphi %s664_s16, %s814_s16   ;;  %s620_s15 = sphi %s662_s15, %s813_s15   ;;  %s616_s14 = sphi %s660_s14, %s812_s14   ;;  %s612_s13 = sphi %s658_s13, %s811_s13   ;;  %s608_s12 = sphi %s656_s12, %s810_s12  }
   0x6   : > { %s29_s20 = sadd.s32 1, %s624_s16  ;;  %s118_s21 = sadd.s32 1, %s616_s14 }
   0x7   : > { %p31_p0 = scmp.ge.s32.totalorder %s29_s20, 2  ;;  %p128_p1 = scmp.ne.s32.totalorder %s616_s14, %s612_s13 }
   0x8   : > { %p129_p2 = scmp.eq.s32.totalorder %s431_s18, 1  ;;  %p134_p3 = scmp.ne.s32.totalorder %s612_s13, %s608_s12 }
   0x9   : > { %s816_s20 = smov (%p31_p0, %s29_s20), 0  ;;  %p135_p5 = scmp.eq.s32.totalorder %s432_s19, 1 }
   0xa   : > { %p696_p4 = por %p129_p2, %p128_p1  ;;  %s113_s23 = ssub.s32 %s624_s16, %s816_s20 }
   0xb   : > { %p433_p6 = scmp.ge.s32.totalorder %s628_s17, 1  ;;  %p116_p7 = scmp.eq.s32.totalorder %s113_s23, 0 }
   0xc   : > { %p703_p8 = por %p135_p5, %p134_p3  ;;  %p142_p9 = scmp.lt.s32.totalorder %s628_s17, 3 }
   0xd   : > { %s709_s25 = scalar_select %p116_p7, %s616_s14, %s118_s21  }
   0xe   : > { %p711_p10 = pnand %p433_p6, %p142_p9  ;;  %p715_p11 = scmp.eq.s32.totalorder %s431_s18, 0 }
   0xf   : > { %s630_s28 = smov [#allocation3]  }
  0x10   : > { %p457_p12 = pneg %p711_p10  ;;  %s157_s29 = sshll.u32 %s630_s28, 4  ;;  %s158_s29 = int_to_ptr.vmem [resolvable:$true] %s157_s29 }
  0x11   : > { %s533_s30 = scalar_lea.vmem %s158_s29, 128  ;;  %p541_p5 = scmp.lt.s32.totalorder %s158_s29, %s158_s29 }
  0x12   : > { %p458_p13 = pnand %p715_p11, %p457_p12  ;;  %p534_p1 = scmp.ne.s32.totalorder %s158_s29, %s533_s30 }
  0x13   : > { %p542_p6 = scmp.lt.s32.totalorder %s533_s30, %s533_s30 }
  0x14   : > { %p524_p0 = pneg %p458_p13 }
  0x15   : > { %p543_p7 = por %p542_p6, %p541_p5 }
  0x16   : > { %p536_p2 = pnand %p534_p1, %p524_p0 }
  0x18   : > { %p537_p3 = pneg %p536_p2 }
  0x1a   : > { %p544_p9 = pnand %p543_p7, %p537_p3 }
  0x1c   : > { %547 = shalt.err (!%p544_p9)
}
  0x1d   : > { %460 = dma.hbm_to_vmem [thread:$0]  (!%p458_p13), %s804_s2, 128, %s158_s29, [#allocation4]  }
  0x1e   : > { %189 = sbr.rel (%p711_p10) target bundleno = 208 (0xd0), region = 32 }
  0x23   : > { %599 = dma.done.wait (%p715_p11), [#allocation4], 128  }
  0x24   : > { %601 = vsyncadd (%p715_p11), [#allocation4], 4294967168  ;;  %p221_p12 = scmp.lt.s32.totalorder %s620_s15, 1  ;;  %v631_v0 = vmov 0   ;;  %vm250_vm0 = vcmask 256000   ;;  %v632_v1 = vmov 0.0   ;;  %v260_v4 = vlaneseq }
  0x25   : > { %521 = vset.pattern.permute.xlu0 %v631_v0  ;;  %251 = vst.msk [vmem:[#allocation2] sm:$0x7] %vm250_vm0, %v632_v1  ;;  %vm252_vm1 = vcmask 253952   ;;  %vm254_vm2 = vcmask 261120   ;;  %v257_v12 = vld [vmem:[#allocation3] sm:$0x1f] }
  0x26   : > { %s222_s6 = scalar_select %p221_p12, %s620_s15, 1  ;;  %253 = vst.msk [vmem:[#allocation2 + $0x13] sm:$0x1] %vm252_vm1, %v632_v1  ;;  %v261_v6 = vshrl.u32 %v260_v4, 7 }
  0x27   : > { %s218_s21 = sand.u32 1, %s612_s13   ;;  %s450_s28 = sshll.u32 %s620_s15, 8 }
  0x28   : > { %s448_s7 = sshll.u32 %s222_s6, 4  ;;  %v262_v10 = vsub.s32 0, %v261_v6  ;;  %v272_v11 = vsub.s32 1, %v261_v6  ;;  %v282_v14 = vsub.s32 2, %v261_v6  ;;  %v292_v18 = vsub.s32 3, %v261_v6  ;;  %s438_s23 = sshll.u32 %s218_s21, 4 }
  0x29   : > { %s233_s10 = scalar_lea.vmem %s803_s1, %s448_s7  ;;  %s228_s19 = scalar_lea.vmem %s802_s0, %s448_s7  ;;  %v302_v20 = vsub.s32 4, %v261_v6 }
  0x2a   : > { %v236_v2 = vld [vmem:[%s233_s10] sm:$0xff]  ;;  %v237_v3 = vld [vmem:[%s233_s10 + $0x8] sm:$0xff]  ;;  %v263_v16 = vrot.slane %v257_v12, %v262_v10  ;;  %v273_v17 = vrot.slane %v257_v12, %v272_v11  ;;  %v283_v19 = vrot.slane %v257_v12, %v282_v14  ;;  %v293_v24 = vrot.slane %v257_v12, %v292_v18  ;;  %s220_s26 = scalar_lea.vmem [#allocation6], %s438_s23  ;;  %s752_s4 = scalar_lea.hbm %s805_s3, %s450_s28 }
  0x2b   : > { %240 = vperm.xlu0 %521, %v236_v2   ;;  %v234_v5 = vld [vmem:[%s228_s19] sm:$0xff]  ;;  %v235_v9 = vld [vmem:[%s228_s19 + $0x8] sm:$0xff]  ;;  %v303_v28 = vrot.slane %v257_v12, %v302_v20  ;;  %s327_s27 = sshll.u32 %s220_s26, 4  ;;  %s757_s5 = scalar_lea.sflag [#allocation5], %s218_s21  ;;  %s747_s27 = int_to_ptr.vmem [resolvable:$true] %s327_s27 }
  0x2c   : > { %s548_s15 = scalar_lea.vmem %s747_s27, 256  ;;  %s633_s6 = smov [#allocation6]  }
  0x2d   : > { %p549_p10 = scmp.ne.s32.totalorder %s747_s27, %s548_s15  ;;  %s552_s7 = sshll.u32 %s633_s6, 4  ;;  %s553_s7 = int_to_ptr.vmem [resolvable:$false] %s552_s7 }
  0x2e   : > { %s554_s8 = scalar_lea.vmem %s553_s7, 512  ;;  %p555_p0 = scmp.lt.s32.totalorder %s747_s27, %s553_s7 }
  0x2f   : > { %245 = vperm.xlu0 %521, %v237_v3   ;;  %p550_p11 = pnand %p549_p10, %p696_p4  ;;  %p556_p1 = scmp.lt.s32.totalorder %s554_s8, %s548_s15 }
  0x31   : > { %p551_p13 = pneg %p550_p11  ;;  %p557_p2 = por %p556_p1, %p555_p0 }
  0x33   : > { %p558_p3 = pnand %p557_p2, %p551_p13 }
  0xa6   : > { %v241_v7 = vpop.permute.xlu0 %240 }
  0xa7   : > { %v248_v8 = vmul.f32 %v241_v7, %v234_v5 }
  0xa9   : > { %255 = vst.msk [vmem:[#allocation2 + $0x3] sm:$0xff] %vm254_vm2, %v248_v8 }
  0xaa   : > { %v246_v13 = vpop.permute.xlu0 %245 }
  0xab   : > { %v249_v15 = vmul.f32 %v246_v13, %v235_v9 }
  0xad   : > { %256 = vst.msk [vmem:[#allocation2 + $0xb] sm:$0xff] %vm254_vm2, %v249_v15 }
  0xb0   : > { %v258_v21 = vld [vmem:[#allocation2] sm:$0xff] }
  0xb1   : > { %v268_v22 = vld [vmem:[#allocation2 + $0x1] sm:$0xff]  ;;  %v264_v25 = vmul.f32 %v263_v16, %v258_v21 }
  0xb2   : > { %v278_v23 = vld [vmem:[#allocation2 + $0x2] sm:$0xff]  ;;  %v274_v26 = vmul.f32 %v273_v17, %v268_v22 }
  0xb3   : > { %v288_v27 = vld [vmem:[#allocation2 + $0x3] sm:$0xff]  ;;  %v284_v30 = vmul.f32 %v283_v19, %v278_v23 }
  0xb4   : > { %v276_v29 = vadd.f32 %v274_v26, %v264_v25  ;;  %v259_v31 = vld [vmem:[#allocation2 + $0x8] sm:$0xff]  ;;  %v294_v37 = vmul.f32 %v293_v24, %v288_v27 }
  0xb5   : > { %v269_v32 = vld [vmem:[#allocation2 + $0x9] sm:$0xff]  ;;  %v265_v34 = vmul.f32 %v263_v16, %v259_v31 }
  0xb6   : > { %v279_v33 = vld [vmem:[#allocation2 + $0xa] sm:$0xff]  ;;  %v275_v35 = vmul.f32 %v273_v17, %v269_v32  ;;  %v286_v36 = vadd.f32 %v284_v30, %v276_v29 }
  0xb7   : > { %v298_v38 = vld [vmem:[#allocation2 + $0x4] sm:$0xff]  ;;  %v285_v41 = vmul.f32 %v283_v19, %v279_v33  ;;  %v299_v44 = vld [vmem:[#allocation2 + $0xc] sm:$0xff] }
  0xb8   : > { %v289_v39 = vld [vmem:[#allocation2 + $0xb] sm:$0xff]  ;;  %v277_v40 = vadd.f32 %v275_v35, %v265_v34  ;;  %v296_v42 = vadd.f32 %v294_v37, %v286_v36  ;;  %v304_v43 = vmul.f32 %v303_v28, %v298_v38  ;;  %v305_v49 = vmul.f32 %v303_v28, %v299_v44 }
  0xb9   : > { %v295_v46 = vmul.f32 %v293_v24, %v289_v39 }
  0xba   : > { %v287_v45 = vadd.f32 %v285_v41, %v277_v40  ;;  %v306_v47 = vadd.f32 %v304_v43, %v296_v42 }
  0xbc   : > { %v297_v48 = vadd.f32 %v295_v46, %v287_v45  ;;  %v308_v50 = vmul.f32 %v306_v47, %v241_v7 }
  0xbe   : > { %v307_v51 = vadd.f32 %v305_v49, %v297_v48  ;;  %310 = vst.msk [vmem:[%s220_s26] sm:$0xff] %vm254_vm2, %v308_v50 }
  0xc0   : > { %v309_v52 = vmul.f32 %v307_v51, %v246_v13 }
  0xc2   : > { %311 = vst.msk [vmem:[%s220_s26 + $0x8] sm:$0xff] %vm254_vm2, %v309_v52 }
  0xc3   : > { %561 = shalt.err (!%p558_p3)
}
  0xc4   : > { %s562_s9 = scalar_lea.hbm %s752_s4, 256  ;;  %s566_s18 = scalar_lea.hbm %s805_s3, 512 }
  0xc5   : > { %p563_p5 = scmp.ne.s32.totalorder %s752_s4, %s562_s9  ;;  %p567_p9 = scmp.lt.s32.totalorder %s752_s4, %s805_s3 }
  0xc6   : > { %p568_p12 = scmp.lt.s32.totalorder %s566_s18, %s562_s9 }
  0xc7   : > { %p564_p6 = pnand %p563_p5, %p696_p4 }
  0xc8   : > { %p569_p10 = por %p568_p12, %p567_p9 }
  0xc9   : > { %p565_p7 = pneg %p564_p6 }
  0xcb   : > { %p570_p11 = pnand %p569_p10, %p565_p7 }
  0xcd   : > { %573 = shalt.err (!%p570_p11)
}
  0xce   : > { %s634_s23 = smov 128   ;;  %s635_s26 = smov 8  }
  0xcf   : > { %455 = dma.vmem_to_hbm [thread:$0]  (%p696_p4), %s747_s27, 256, %s752_s4, %s757_s5, %s634_s23, %s634_s23, %s635_s26  }
  0xd0 PF: > { %p467_p13 = scmp.ge.s32.totalorder %s628_s17, 2  ;;  %s342_s28 = sand.u32 1, %s608_s12  }
  0xd1   : > { %s343_s29 = scalar_lea.sflag [#allocation5], %s342_s28 }
  0xd2   : > { %p462_p0 = pnand %p467_p13, %p703_p8 }
  0xd4   : > { %p463_p1 = pneg %p462_p0 }
  0xd6   : > { %603 = dma.done.wait (%p463_p1), %s343_s29, 256  }
  0xd7   : > { %605 = vsyncadd (%p463_p1), %s343_s29, 4294967040  ;;  %s17_s17 = sadd.s32 1, %s628_s17   ;;  %s810_s12 = smov %s612_s13 }
  0xd8   : > { %p14_p2 = scmp.ge.s32.totalorder %s17_s17, 4   ;;  %s811_s13 = smov %s616_s14 }
  0xd9   : > { %s812_s14 = smov %s709_s25  ;;  %s813_s15 = smov %s624_s16 }
  0xda   : > { %s814_s16 = smov %s816_s20  ;;  %16 = sbr.rel (!%p14_p2) target bundleno = 5 (0x5), region = 76 }
  0xdf   :  { %348 = vsyncpa [#allocation4], 1 }
  0xe0   :  { %350 = vsyncpa [#allocation4 + $0x1], 1 }
  0xe1   :  { %351 = vsyncpa [#allocation5], 1 }
  0xe2   :  { %353 = vsyncpa [#allocation5 + $0x1], 1 }

</bundles_post_ra>
